<compile_context>
chip_gen: v7x
topology: tpu7x:2x2x1
jax: 0.10.0
libtpu: 0.0.40
codegen_flags: <defaults>
</compile_context>

<pallas_src>
import numpy as np
import jax
import jax.numpy as jnp
from jax.experimental import pallas as pl
from jax.experimental.pallas import tpu as pltpu

FEAT = 512           # CLIP ViT-B/32 embedding dim (module-implied)
OUT = 4              # bbox_proj output dim
OUT_PAD = 128        # lane-dense padded output width (keep 128 on v7x)
TB_MAX = 1024        # max batch-tile rows per grid step


def _round_up(x, m):
    return ((x + m - 1) // m) * m


def _pick_batch_tile(B):
    """Pick (TB, grid) so that TB is a multiple of 16 and grid >= 2 when B > 16."""
    if B <= 16:
        # Single block equal to the full batch dim (legal: block dim == array dim).
        return B, 1
    half = -(-B // 2)                                  # aim for >= 2 grid steps (v7x 2 TCs)
    TB = max(16, min(TB_MAX, _round_up(half, 16)))
    grid = -(-B // TB)
    return TB, grid


def _bbox_head_kernel(img_ref, txt_ref, w_img_ref, w_txt_ref, b_ref, out_ref):
    """Fused bbox head on one (TB, FEAT) batch tile.

    (x / ||x||) @ W == (x @ W) * rsqrt(sum(x*x))  (per-row scalar commutes), so
    the rescale is applied to the small (TB, OUT_PAD) matmul result and the
    reciprocal-sqrt runs on the EUP.  Features/weights are bf16 (MXU native);
    the norm path and accumulation are f32.
    cat([img_n, txt_n], -1) @ W == img_n @ W[:FEAT] + txt_n @ W[FEAT:].
    """
    img = img_ref[...]                                   # (TB, FEAT) bf16
    txt = txt_ref[...]                                   # (TB, FEAT) bf16

    img_f = img.astype(jnp.float32)
    txt_f = txt.astype(jnp.float32)
    inv_img = jax.lax.rsqrt(jnp.sum(img_f * img_f, axis=-1, keepdims=True))  # (TB,1)
    inv_txt = jax.lax.rsqrt(jnp.sum(txt_f * txt_f, axis=-1, keepdims=True))  # (TB,1)

    y_img = jnp.dot(img, w_img_ref[...], preferred_element_type=jnp.float32)  # (TB,OUT_PAD)
    y_txt = jnp.dot(txt, w_txt_ref[...], preferred_element_type=jnp.float32)

    y = y_img * inv_img + y_txt * inv_txt + b_ref[...]   # (TB, OUT_PAD) f32
    out_ref[...] = jnp.maximum(y, 0.0)                   # ReLU, unmasked lane-dense store


def prepare_bbox_head_params(w, b):
    """One-time parameter prep (hoisted out of the per-call path).

    w: (2*FEAT, OUT) f32 (torch Linear weight, transposed); b: (OUT,) f32.
    Returns bf16 split weights zero-padded to OUT_PAD lanes and an f32 padded bias.
    """
    w = w.astype(jnp.float32)
    b = b.astype(jnp.float32)
    w_img = jnp.zeros((FEAT, OUT_PAD), jnp.float32).at[:, :OUT].set(w[:FEAT, :])
    w_txt = jnp.zeros((FEAT, OUT_PAD), jnp.float32).at[:, :OUT].set(w[FEAT:, :])
    b_pad = jnp.zeros((1, OUT_PAD), jnp.float32).at[:, :OUT].set(b.reshape(1, OUT))
    return {
        "w_img": w_img.astype(jnp.bfloat16),
        "w_txt": w_txt.astype(jnp.bfloat16),
        "b_pad": b_pad,                                   # bias stays f32 (added post-acc)
    }


def bbox_head(image_features, text_features, head_params):
    """image_features, text_features: (B, FEAT); head_params from prepare_bbox_head_params."""
    B = image_features.shape[0]
    TB, grid = _pick_batch_tile(B)

    # bf16 feature path: halves the dominant HBM read traffic; the cast fuses
    # into the (stub) encoder epilogue under XLA.  In a real pipeline the
    # encoders should emit bf16 directly.
    img16 = image_features.astype(jnp.bfloat16)
    txt16 = text_features.astype(jnp.bfloat16)

    out = pl.pallas_call(
        _bbox_head_kernel,
        out_shape=jax.ShapeDtypeStruct((B, OUT_PAD), jnp.float32),
        grid=(grid,),
        in_specs=[
            pl.BlockSpec((TB, FEAT), lambda i: (i, 0)),        # image features (bf16)
            pl.BlockSpec((TB, FEAT), lambda i: (i, 0)),        # text features (bf16)
            pl.BlockSpec((FEAT, OUT_PAD), lambda i: (0, 0)),   # W[:FEAT]  (resident)
            pl.BlockSpec((FEAT, OUT_PAD), lambda i: (0, 0)),   # W[FEAT:]  (resident)
            pl.BlockSpec((1, OUT_PAD), lambda i: (0, 0)),      # bias      (resident)
        ],
        out_specs=pl.BlockSpec((TB, OUT_PAD), lambda i: (i, 0)),
        compiler_params=pltpu.CompilerParams(
            dimension_semantics=("parallel",),
            vmem_limit_bytes=32 * 1024 * 1024),
    )(img16, txt16, head_params["w_img"], head_params["w_txt"], head_params["b_pad"])

    return out[:, :OUT]


# ---------------------------------------------------------------------------
# Glue: deterministic stub CLIP encoders + deterministic bbox_proj parameters.
# TODO(synk): full CLIP ViT-B/32 image/text transformers are external
#             pretrained models and are not replicated; stubbed with a linear
#             projection / embedding mean.
# ---------------------------------------------------------------------------
def stub_encode_image(imgs, w_enc):
    # imgs: (B, C, H, W) NCHW -> flatten -> (B, FEAT)
    B = imgs.shape[0]
    return imgs.reshape(B, -1) @ w_enc


def stub_encode_text(tokens, embed_table):
    # tokens: (B, T) int32 -> mean of embeddings -> (B, FEAT)
    return jnp.mean(embed_table[tokens], axis=1)


def clip_detector_forward(imgs, tokens, params, head_params):
    image_features = stub_encode_image(imgs, params["w_img_enc"])
    text_features = stub_encode_text(tokens, params["txt_embed"])
    return bbox_head(image_features, text_features, head_params)


def reference_forward(imgs, tokens, params):
    image_features = stub_encode_image(imgs, params["w_img_enc"])
    text_features = stub_encode_text(tokens, params["txt_embed"])
    image_features = image_features / jnp.linalg.norm(
        image_features, axis=-1, keepdims=True)
    text_features = text_features / jnp.linalg.norm(
        text_features, axis=-1, keepdims=True)
    x = jnp.concatenate([image_features, text_features], axis=1)
    return jnp.maximum(x @ params["bbox_w"] + params["bbox_b"], 0.0)


if __name__ == "__main__":
    key = jax.random.PRNGKey(0)
    k1, k2, k3, k4, k5, k6 = jax.random.split(key, 6)

    B, C, H, W = 2, 3, 16, 16       # small NCHW images
    T, VOCAB = 8, 64                # small token sequences

    imgs = jax.random.uniform(k1, (B, C, H, W), dtype=jnp.float32)
    tokens = jax.random.randint(k2, (B, T), 0, VOCAB, dtype=jnp.int32)

    # Deterministic parameters (synthetic; shapes follow the module definition).
    params = {
        "w_img_enc": jax.random.normal(k3, (C * H * W, FEAT), jnp.float32) * 0.02,
        "txt_embed": jax.random.normal(k4, (VOCAB, FEAT), jnp.float32) * 0.02,
        # nn.Linear(1024, 4): weight is (4, 1024) in torch; stored transposed here.
        "bbox_w": jax.random.uniform(
            k5, (2 * FEAT, OUT), jnp.float32,
            minval=-1.0 / np.sqrt(2 * FEAT), maxval=1.0 / np.sqrt(2 * FEAT)),
        "bbox_b": jax.random.uniform(
            k6, (OUT,), jnp.float32,
            minval=-1.0 / np.sqrt(2 * FEAT), maxval=1.0 / np.sqrt(2 * FEAT)),
    }

    # One-time head-parameter preparation (hoisted out of the forward path).
    head_params = prepare_bbox_head_params(params["bbox_w"], params["bbox_b"])

    out = clip_detector_forward(imgs, tokens, params, head_params)
    out = jax.block_until_ready(out)

    ref = reference_forward(imgs, tokens, params)
    # bf16 feature/weight path => bf16-level tolerance vs. the f32 reference.
    np.testing.assert_allclose(np.asarray(out), np.asarray(ref),
                               rtol=2e-2, atol=5e-3)

    print("KERNEL_OK")
</pallas_src>

<mosaic_0001>
module attributes {stable_mosaic.version = 11 : i64} {
  func.func @_bbox_head_kernel(%arg0: i32, %arg1: memref<2x512xbf16, #tpu.memory_space<vmem>>, %arg2: memref<2x512xbf16, #tpu.memory_space<vmem>>, %arg3: memref<512x128xbf16, #tpu.memory_space<vmem>>, %arg4: memref<512x128xbf16, #tpu.memory_space<vmem>>, %arg5: memref<1x128xf32, #tpu.memory_space<vmem>>, %arg6: memref<2x128xf32, #tpu.memory_space<vmem>>) attributes {dimension_semantics = [#tpu.dimension_semantics<parallel>], iteration_bounds = array<i64: 1>, scalar_prefetch = 0 : i64, scratch_operands = 0 : i64, tpu.core_type = #tpu.core_type<tc>, window_params = [{transform_indices = @transform_0, window_bounds = array<i64: 2, 512>}, {transform_indices = @transform_1, window_bounds = array<i64: 2, 512>}, {pipeline_mode = #tpu.pipeline_mode<synchronous>, transform_indices = @transform_2, window_bounds = array<i64: 512, 128>}, {pipeline_mode = #tpu.pipeline_mode<synchronous>, transform_indices = @transform_3, window_bounds = array<i64: 512, 128>}, {pipeline_mode = #tpu.pipeline_mode<synchronous>, transform_indices = @transform_4, window_bounds = array<i64: 1, 128>}, {transform_indices = @transform_5, window_bounds = array<i64: 2, 128>}]} {
    %c0 = arith.constant 0 : index
    %c0_0 = arith.constant 0 : index
    %0 = vector.load %arg1[%c0, %c0_0] : memref<2x512xbf16, #tpu.memory_space<vmem>>, vector<2x512xbf16>
    %c0_1 = arith.constant 0 : index
    %c0_2 = arith.constant 0 : index
    %1 = vector.load %arg2[%c0_1, %c0_2] : memref<2x512xbf16, #tpu.memory_space<vmem>>, vector<2x512xbf16>
    %2 = arith.extf %0 : vector<2x512xbf16> to vector<2x512xf32>
    %3 = arith.extf %1 : vector<2x512xbf16> to vector<2x512xf32>
    %4 = arith.mulf %2, %2 : vector<2x512xf32>
    %cst = arith.constant dense<0.000000e+00> : vector<2xf32>
    %5 = vector.multi_reduction <add>, %4, %cst [1] : vector<2x512xf32> to vector<2xf32>
    %6 = vector.shape_cast %5 : vector<2xf32> to vector<2x1xf32>
    %7 = math.rsqrt %6 : vector<2x1xf32>
    %8 = arith.mulf %3, %3 : vector<2x512xf32>
    %cst_3 = arith.constant dense<0.000000e+00> : vector<2xf32>
    %9 = vector.multi_reduction <add>, %8, %cst_3 [1] : vector<2x512xf32> to vector<2xf32>
    %10 = vector.shape_cast %9 : vector<2xf32> to vector<2x1xf32>
    %11 = math.rsqrt %10 : vector<2x1xf32>
    %c0_4 = arith.constant 0 : index
    %c0_5 = arith.constant 0 : index
    %12 = vector.load %arg3[%c0_4, %c0_5] : memref<512x128xbf16, #tpu.memory_space<vmem>>, vector<512x128xbf16>
    %cst_6 = arith.constant dense<0.000000e+00> : vector<2x128xf32>
    %13 = tpu.matmul %0, %12, %cst_6 {dimension_numbers = #tpu.dot_dimension_numbers<[1], [0], [0], [1], [0, 0, 1, 1], [], []>} : vector<2x512xbf16>, vector<512x128xbf16>, vector<2x128xf32> -> vector<2x128xf32>
    %c0_7 = arith.constant 0 : index
    %c0_8 = arith.constant 0 : index
    %14 = vector.load %arg4[%c0_7, %c0_8] : memref<512x128xbf16, #tpu.memory_space<vmem>>, vector<512x128xbf16>
    %cst_9 = arith.constant dense<0.000000e+00> : vector<2x128xf32>
    %15 = tpu.matmul %1, %14, %cst_9 {dimension_numbers = #tpu.dot_dimension_numbers<[1], [0], [0], [1], [0, 0, 1, 1], [], []>} : vector<2x512xbf16>, vector<512x128xbf16>, vector<2x128xf32> -> vector<2x128xf32>
    %16 = vector.broadcast %7 : vector<2x1xf32> to vector<2x128xf32>
    %17 = arith.mulf %13, %16 : vector<2x128xf32>
    %18 = vector.broadcast %11 : vector<2x1xf32> to vector<2x128xf32>
    %19 = arith.mulf %15, %18 : vector<2x128xf32>
    %20 = arith.addf %17, %19 : vector<2x128xf32>
    %c0_10 = arith.constant 0 : index
    %c0_11 = arith.constant 0 : index
    %21 = vector.load %arg5[%c0_10, %c0_11] : memref<1x128xf32, #tpu.memory_space<vmem>>, vector<1x128xf32>
    %22 = vector.broadcast %21 : vector<1x128xf32> to vector<2x128xf32>
    %23 = arith.addf %20, %22 : vector<2x128xf32>
    %cst_12 = arith.constant 0.000000e+00 : f32
    %24 = vector.broadcast %cst_12 : f32 to vector<2x128xf32>
    %25 = arith.maximumf %23, %24 : vector<2x128xf32>
    %c0_13 = arith.constant 0 : index
    %c0_14 = arith.constant 0 : index
    %26 = vector.load %arg6[%c0_13, %c0_14] : memref<2x128xf32, #tpu.memory_space<vmem>>, vector<2x128xf32>
    tpu.vector_store %arg6[%c0_13, %c0_14], %25 {strides = array<i32>} : memref<2x128xf32, #tpu.memory_space<vmem>>, vector<2x128xf32>,
    return
  }
  func.func @transform_0(%arg0: i32) -> (i32, i32) {
    %c0_i32 = arith.constant 0 : i32
    %c0_i32_0 = arith.constant 0 : i32
    return %arg0, %c0_i32 : i32, i32
  }
  func.func @transform_1(%arg0: i32) -> (i32, i32) {
    %c0_i32 = arith.constant 0 : i32
    %c0_i32_0 = arith.constant 0 : i32
    return %arg0, %c0_i32 : i32, i32
  }
  func.func @transform_2(%arg0: i32) -> (i32, i32) {
    %c0_i32 = arith.constant 0 : i32
    %c0_i32_0 = arith.constant 0 : i32
    %c0_i32_1 = arith.constant 0 : i32
    return %c0_i32, %c0_i32_0 : i32, i32
  }
  func.func @transform_3(%arg0: i32) -> (i32, i32) {
    %c0_i32 = arith.constant 0 : i32
    %c0_i32_0 = arith.constant 0 : i32
    %c0_i32_1 = arith.constant 0 : i32
    return %c0_i32, %c0_i32_0 : i32, i32
  }
  func.func @transform_4(%arg0: i32) -> (i32, i32) {
    %c0_i32 = arith.constant 0 : i32
    %c0_i32_0 = arith.constant 0 : i32
    %c0_i32_1 = arith.constant 0 : i32
    return %c0_i32, %c0_i32_0 : i32, i32
  }
  func.func @transform_5(%arg0: i32) -> (i32, i32) {
    %c0_i32 = arith.constant 0 : i32
    %c0_i32_0 = arith.constant 0 : i32
    return %arg0, %c0_i32 : i32, i32
  }
}

</mosaic_0001>

<bundles_post_ra>
// kernel: tpu_custom_call.1
= control target key start
LH: loop header
LB: loop body
LE: loop exit
PB: predicated region body
PF: predicated region fallthrough
CT: control target
= control target key end

     0   :  { %10 = vsyncpa [#allocation3], 0  ;;  %s1376_s0 = inlined_call_operand.hbm [shape: bf16[2,512], index: 0, kind: input, shape index: {}]   ;;  %s1377_s1 = inlined_call_operand.hbm [shape: bf16[2,512], index: 1, kind: input, shape index: {}]   ;;  %s1378_s2 = inlined_call_operand.hbm [shape: bf16[512,128], index: 2, kind: input, shape index: {}]   ;;  %s1379_s3 = inlined_call_operand.hbm [shape: bf16[512,128], index: 3, kind: input, shape index: {}]   ;;  %s1380_s4 = inlined_call_operand.vmem [shape: f32[1,128], index: 4, kind: input, shape index: {}]   ;;  %s1381_s5 = inlined_call_operand.hbm [shape: f32[2,128], index: 5, kind: output, shape index: {}]  }
   0x1   :  { %11 = vsyncpa [#allocation6], 0 }
   0x2   :  { %12 = vsyncpa [#allocation9], 0 }
   0x3   :  { %13 = vsyncpa [#allocation4], 0  ;;  %s1252_s18 = smov [#allocation5]   ;;  %s1253_s20 = smov [#allocation2]  }
   0x4   :  { %s30_s19 = sshll.u32 %s1252_s18, 4  ;;  %s20_s21 = sshll.u32 %s1253_s20, 4  ;;  %s31_s19 = int_to_ptr.vmem [resolvable:$true] %s30_s19  ;;  %s21_s21 = int_to_ptr.vmem [resolvable:$true] %s20_s21 }
   0x5   :  { %s1134_s24 = scalar_lea.hbm %s1377_s1, 64 }
   0x6   :  { %p1135_p0 = scmp.ne.s32.totalorder %s1377_s1, %s1134_s24  ;;  %p1138_p1 = scmp.lt.u32.totalorder %s1134_s24, %s1377_s1 }
   0x8   :  { %p1140_p2 = pnand %p1138_p1, %p1135_p0 }
   0xa   :  { %1143 = shalt.err (!%p1140_p2)
}
   0xb   :  { %s1144_s29 = scalar_lea.vmem %s31_s19, 64  ;;  %p1149_p4 = scmp.lt.s32.totalorder %s31_s19, %s31_s19 }
   0xc   :  { %p1145_p3 = scmp.ne.s32.totalorder %s31_s19, %s1144_s29  ;;  %p1150_p5 = scmp.lt.s32.totalorder %s1144_s29, %s1144_s29 }
   0xe   :  { %p1151_p6 = por %p1150_p5, %p1149_p4 }
  0x10   :  { %p1152_p7 = pnand %p1151_p6, %p1145_p3 }
  0x12   :  { %1155 = shalt.err (!%p1152_p7)
}
  0x13   :  { %33 = dma.hbm_to_vmem [thread:$0]  %s1377_s1, 64, %s31_s19, [#allocation6]  }
  0x14   :  { %s1156_s9 = scalar_lea.hbm %s1376_s0, 64 }
  0x15   :  { %p1157_p8 = scmp.ne.s32.totalorder %s1376_s0, %s1156_s9  ;;  %p1160_p9 = scmp.lt.u32.totalorder %s1156_s9, %s1376_s0 }
  0x17   :  { %p1162_p10 = pnand %p1160_p9, %p1157_p8 }
  0x19   :  { %1165 = shalt.err (!%p1162_p10)
}
  0x1a   :  { %s1166_s14 = scalar_lea.vmem %s21_s21, 64  ;;  %p1171_p12 = scmp.lt.s32.totalorder %s21_s21, %s21_s21 }
  0x1b   :  { %p1167_p11 = scmp.ne.s32.totalorder %s21_s21, %s1166_s14  ;;  %p1172_p13 = scmp.lt.s32.totalorder %s1166_s14, %s1166_s14 }
  0x1d   :  { %p1173_p0 = por %p1172_p13, %p1171_p12 }
  0x1f   :  { %p1174_p1 = pnand %p1173_p0, %p1167_p11 }
  0x21   :  { %1177 = shalt.err (!%p1174_p1)
}
  0x22   :  { %23 = dma.hbm_to_vmem [thread:$0]  %s1376_s0, 64, %s21_s21, [#allocation3]  }
  0x23   :  { %s1254_s16 = smov [#allocation7]   ;;  %s1178_s20 = scalar_lea.hbm %s1378_s2, 4096 }
  0x24   :  { %s39_s17 = sshll.u32 %s1254_s16, 4  ;;  %p1179_p2 = scmp.ne.s32.totalorder %s1378_s2, %s1178_s20  ;;  %s40_s17 = int_to_ptr.vmem [resolvable:$true] %s39_s17 }
  0x25   :  { %p1182_p3 = scmp.lt.u32.totalorder %s1178_s20, %s1378_s2 }
  0x27   :  { %p1184_p4 = pnand %p1182_p3, %p1179_p2 }
  0x29   :  { %1187 = shalt.err (!%p1184_p4)
}
  0x2a   :  { %s1188_s26 = scalar_lea.vmem %s40_s17, 4096  ;;  %p1193_p6 = scmp.lt.s32.totalorder %s40_s17, %s40_s17 }
  0x2b   :  { %p1189_p5 = scmp.ne.s32.totalorder %s40_s17, %s1188_s26  ;;  %p1194_p7 = scmp.lt.s32.totalorder %s1188_s26, %s1188_s26 }
  0x2d   :  { %p1195_p8 = por %p1194_p7, %p1193_p6 }
  0x2f   :  { %p1196_p9 = pnand %p1195_p8, %p1189_p5 }
  0x31   :  { %1199 = shalt.err (!%p1196_p9)
}
  0x32   :  { %s1255_s0 = smov 64   ;;  %s1256_s21 = smov 4  }
  0x33   :  { %45 = dma.hbm_to_vmem [thread:$0]  %s1378_s2, 4096, %s40_s17, [#allocation6], %s1255_s0, %s1255_s0, %s1256_s21  }
  0x34   :  { %s1257_s29 = smov [#allocation8]   ;;  %s1200_s8 = scalar_lea.hbm %s1379_s3, 4096 }
  0x35   :  { %s51_s30 = sshll.u32 %s1257_s29, 4  ;;  %p1201_p10 = scmp.ne.s32.totalorder %s1379_s3, %s1200_s8  ;;  %s52_s30 = int_to_ptr.vmem [resolvable:$true] %s51_s30 }
  0x36   :  { %p1204_p11 = scmp.lt.u32.totalorder %s1200_s8, %s1379_s3 }
  0x38   :  { %p1206_p12 = pnand %p1204_p11, %p1201_p10 }
  0x3a   :  { %1209 = shalt.err (!%p1206_p12)
}
  0x3b   :  { %s1210_s13 = scalar_lea.vmem %s52_s30, 4096  ;;  %p1215_p0 = scmp.lt.s32.totalorder %s52_s30, %s52_s30 }
  0x3c   :  { %p1211_p13 = scmp.ne.s32.totalorder %s52_s30, %s1210_s13  ;;  %p1216_p1 = scmp.lt.s32.totalorder %s1210_s13, %s1210_s13 }
  0x3e   :  { %p1217_p2 = por %p1216_p1, %p1215_p0 }
  0x40   :  { %p1218_p3 = pnand %p1217_p2, %p1211_p13 }
  0x42   :  { %1221 = shalt.err (!%p1218_p3)
}
  0x43   :  { %57 = dma.hbm_to_vmem [thread:$0]  %s1379_s3, 4096, %s52_s30, [#allocation9], %s1255_s0, %s1255_s0, %s1256_s21  }
  0x44   :  { %1244 = dma.done.wait [#allocation3], 64  }
  0x45   :  { %1245 = vsyncadd [#allocation3], 4294967232 }
  0x46   :  { %1246 = dma.done.wait [#allocation6], 4160  }
  0x47   :  { %1247 = vsyncadd [#allocation6], 4294963136 }
  0x48   :  { %1248 = dma.done.wait [#allocation9], 4096  }
  0x49   :  { %1249 = vsyncadd [#allocation9], 4294963200  ;;  %v1066_v0 = vld [vmem:[#allocation7 + $0x40] sm:$0xff]   ;;  %v1070_v4 = vld [vmem:[#allocation7 + $0x48] sm:$0xff]   ;;  %v83_v22 = vlaneseq  ;;  %v1258_v23 = vmov 1966171168  }
  0x4a   :  { %v1067_v1 = vld [vmem:[#allocation7 + $0xc0] sm:$0xff]   ;;  %969 = vmatprep.subr.bf16.mxu0 %v1066_v0  ;;  %v1071_v5 = vld [vmem:[#allocation7 + $0xc8] sm:$0xff]   ;;  %v1074_v8 = vld [vmem:[#allocation7 + $0x50] sm:$0xff]   ;;  %v210_v24 = vunpack.c.l.s4 %v1258_v23  ;;  %v1259_v31 = vmov 1983009808   ;;  %vm100_vm0 = vcmask 1041408  }
  0x4b   :  { %v1068_v2 = vld [vmem:[#allocation7] sm:$0xff]   ;;  %991 = vmatprep.subr.bf16.mxu1 %v1067_v1  ;;  %v1072_v6 = vld [vmem:[#allocation7 + $0x8] sm:$0xff]   ;;  %v1075_v9 = vld [vmem:[#allocation7 + $0xd0] sm:$0xff]   ;;  %v84_v29 = vshrl.u32 %v83_v22, 7  ;;  %v81_v32 = vunpack.c.l.s4 %v1259_v31  ;;  %s1260_s15 = smov [#allocation10]  }
  0x4c   :  { %v1069_v3 = vld [vmem:[#allocation7 + $0x80] sm:$0xff]   ;;  %970 = vmatpush3.bf16.msra.mxu0 %v1068_v2  ;;  %v1073_v7 = vld [vmem:[#allocation7 + $0x88] sm:$0xff]   ;;  %v1076_v10 = vld [vmem:[#allocation7 + $0x10] sm:$0xff]   ;;  %v211_v30 = vunpack.c.0.s8 %v210_v24  ;;  %s893_s16 = sshll.u32 %s1260_s15, 4  ;;  %s894_s16 = int_to_ptr.vmem [resolvable:$true] %s893_s16 }
  0x4d   :  { %992 = vmatpush3.bf16.msra.mxu1 %v1069_v3  ;;  %971 = vmatprep.subr.bf16.mxu0 %v1070_v4  ;;  %v1077_v11 = vld [vmem:[#allocation7 + $0x90] sm:$0xff]   ;;  %v1078_v12 = vld [vmem:[#allocation7 + $0x58] sm:$0xff]   ;;  %v1082_v16 = vld [vmem:[#allocation7 + $0x60] sm:$0xff]   ;;  %v82_v38 = vunpack.c.0.s8 %v81_v32  ;;  %s1222_s17 = scalar_lea.vmem %s894_s16, 32  ;;  %p1227_p5 = scmp.lt.s32.totalorder %s894_s16, %s894_s16 }
  0x4e   :  { %993 = vmatprep.subr.bf16.mxu1 %v1071_v5  ;;  %v1079_v13 = vld [vmem:[#allocation7 + $0xd8] sm:$0xff]   ;;  %v1083_v17 = vld [vmem:[#allocation7 + $0xe0] sm:$0xff]   ;;  %v1086_v20 = vld [vmem:[#allocation7 + $0x68] sm:$0xff]   ;;  %v1339_v37 = vsub.s32 %v211_v30, %v84_v29  ;;  %p1223_p4 = scmp.ne.s32.totalorder %s894_s16, %s1222_s17  ;;  %p1228_p6 = scmp.lt.s32.totalorder %s1222_s17, %s1222_s17 }
  0x4f   :  { %v1080_v14 = vld [vmem:[#allocation7 + $0x18] sm:$0xff]   ;;  %v1084_v18 = vld [vmem:[#allocation7 + $0x20] sm:$0xff]   ;;  %v1087_v21 = vld [vmem:[#allocation7 + $0xe8] sm:$0xff]   ;;  %v1342_v45 = vsub.s32 %v82_v38, %v84_v29 }
  0x50   :  { %972 = vmatpush3.bf16.msra.mxu0 %v1072_v6  ;;  %v1081_v15 = vld [vmem:[#allocation7 + $0x98] sm:$0xff]   ;;  %v1085_v19 = vld [vmem:[#allocation7 + $0xa0] sm:$0xff]   ;;  %v1088_v25 = vld [vmem:[#allocation7 + $0x28] sm:$0xff]   ;;  %p1229_p7 = por %p1228_p6, %p1227_p5 }
  0x51   :  { %994 = vmatpush3.bf16.msra.mxu1 %v1073_v7  ;;  %973 = vmatprep.subr.bf16.mxu0 %v1074_v8  ;;  %v1089_v26 = vld [vmem:[#allocation7 + $0xa8] sm:$0xff]   ;;  %v1090_v27 = vld [vmem:[#allocation7 + $0x70] sm:$0xff]   ;;  %v1094_v35 = vld [vmem:[#allocation7 + $0x78] sm:$0xff]  }
  0x52   :  { %995 = vmatprep.subr.bf16.mxu1 %v1075_v9  ;;  %v1091_v28 = vld [vmem:[#allocation7 + $0xf0] sm:$0xff]   ;;  %v1095_v36 = vld [vmem:[#allocation7 + $0xf8] sm:$0xff]   ;;  %v1098_v44 = vld [vmem:[#allocation8 + $0x40] sm:$0xff]   ;;  %p1230_p8 = pnand %p1229_p7, %p1223_p4 }
  0x53   :  { %v1092_v33 = vld [vmem:[#allocation7 + $0x30] sm:$0xff]   ;;  %v1096_v39 = vld [vmem:[#allocation7 + $0x38] sm:$0xff]   ;;  %v1099_v46 = vld [vmem:[#allocation8 + $0xc0] sm:$0xff]  }
  0x54   :  { %974 = vmatpush3.bf16.msra.mxu0 %v1076_v10  ;;  %v1093_v34 = vld [vmem:[#allocation7 + $0xb0] sm:$0xff]   ;;  %v1097_v40 = vld [vmem:[#allocation7 + $0xb8] sm:$0xff]   ;;  %v1100_v51 = vld [vmem:[#allocation8] sm:$0xff]  }
  0x55   :  { %996 = vmatpush3.bf16.msra.mxu1 %v1077_v11  ;;  %975 = vmatprep.subr.bf16.mxu0 %v1078_v12  ;;  %v73_v41 = vld [vmem:[#allocation2] sm:$0xf]  ;;  %v1102_v55 = vld [vmem:[#allocation8 + $0x48] sm:$0xff]   ;;  %v1101_v57 = vld [vmem:[#allocation8 + $0x80] sm:$0xff]  }
  0x56   :  { %997 = vmatprep.subr.bf16.mxu1 %v1079_v13  ;;  %v75_v42 = vunpack.c.l.bf16 %v73_v41  ;;  %v215_v43 = vrot.slane %v73_v41, %v1339_v37  ;;  %v1103_v61 = vld [vmem:[#allocation8 + $0xc8] sm:$0xff]   ;;  %v1106_v1 = vld [vmem:[#allocation8 + $0x50] sm:$0xff]   ;;  %v1110_v9 = vld [vmem:[#allocation8 + $0x58] sm:$0xff]  }
  0x57   :  { %v1104_v62 = vld [vmem:[#allocation8 + $0x8] sm:$0xff]   ;;  %v1107_v6 = vld [vmem:[#allocation8 + $0xd0] sm:$0xff]   ;;  %v1111_v12 = vld [vmem:[#allocation8 + $0xd8] sm:$0xff]  }
  0x58   :  { %976 = vmatpush3.bf16.msra.mxu0 %v1080_v14  ;;  %v77_v47 = vmul.f32 %v75_v42, %v75_v42  ;;  %v216_v48 = vcombine.high %v215_v43, %v215_v43  ;;  %v223_v49 = vrot.slane %v215_v43, %v1339_v37  ;;  %v1105_v4 = vld [vmem:[#allocation8 + $0x88] sm:$0xff]   ;;  %v1108_v8 = vld [vmem:[#allocation8 + $0x10] sm:$0xff]   ;;  %v1112_v13 = vld [vmem:[#allocation8 + $0x18] sm:$0xff]  }
  0x59   :  { %998 = vmatpush3.bf16.msra.mxu1 %v1081_v15  ;;  %977 = vmatprep.subr.bf16.mxu0 %v1082_v16  ;;  %v1109_v11 = vld [vmem:[#allocation8 + $0x90] sm:$0xff]   ;;  %v1114_v14 = vld [vmem:[#allocation8 + $0x60] sm:$0xff]   ;;  %v1113_v15 = vld [vmem:[#allocation8 + $0x98] sm:$0xff]  }
  0x5a   :  { %999 = vmatprep.subr.bf16.mxu1 %v1083_v17  ;;  %v230_v50 = vrot.slane %v216_v48, %v1339_v37  ;;  %v79_v52 = vcombine.high %v77_v47, %v77_v47  ;;  %v86_v53 = vrot.slane %v77_v47, %v1342_v45  ;;  %v231_v54 = vcombine.high %v223_v49, %v223_v49  ;;  %v1115_v16 = vld [vmem:[#allocation8 + $0xe0] sm:$0xff]   ;;  %v1122_v22 = vld [vmem:[#allocation8 + $0x70] sm:$0xff]   ;;  %v1121_v23 = vld [vmem:[#allocation8 + $0xa8] sm:$0xff]  }
  0x5b   :  { %v1116_v17 = vld [vmem:[#allocation8 + $0x20] sm:$0xff]   ;;  %v1123_v24 = vld [vmem:[#allocation8 + $0xf0] sm:$0xff]   ;;  %v74_v29 = vld [vmem:[#allocation5] sm:$0xf] }
  0x5c   :  { %978 = vmatpush3.bf16.msra.mxu0 %v1084_v18  ;;  %461 = vmatprep.mubr.bf16.mxu0 %v230_v50  ;;  %v232_v56 = vcombine.high %v230_v50, %v230_v50  ;;  %v93_v58 = vrot.slane %v79_v52, %v1342_v45  ;;  %v94_v59 = vcombine.high %v86_v53, %v86_v53  ;;  %v101_v60 = vsel %vm100_vm0, %v86_v53, 0.0  ;;  %v1118_v18 = vld [vmem:[#allocation8 + $0x68] sm:$0xff]   ;;  %v1128_v30 = vld [vmem:[#allocation8 + $0x38] sm:$0xff]  }
  0x5d   :  { %1000 = vmatpush3.bf16.msra.mxu1 %v1085_v19  ;;  %979 = vmatprep.subr.bf16.mxu0 %v1086_v20  ;;  %v1117_v19 = vld [vmem:[#allocation8 + $0xa0] sm:$0xff]   ;;  %v1119_v20 = vld [vmem:[#allocation8 + $0xe8] sm:$0xff]   ;;  %v76_v31 = vunpack.c.l.bf16 %v74_v29  ;;  %v580_v32 = vrot.slane %v74_v29, %v1339_v37 }
  0x5e   :  { %1001 = vmatprep.subr.bf16.mxu1 %v1087_v21  ;;  %501 = vmatprep.mubr.bf16.mxu1 %v232_v56  ;;  %v95_v63 = vcombine.high %v93_v58, %v93_v58  ;;  %v102_v0 = vsel %vm100_vm0, %v94_v59, 0.0  ;;  %v104_v3 = vsel %vm100_vm0, %v93_v58, 0.0  ;;  %v1120_v21 = vld [vmem:[#allocation8 + $0x28] sm:$0xff]  }
  0x5f   :  { %v103_v2 = vadd.f32 %v102_v0, %v101_v60 }
  0x60   :  { %980 = vmatpush3.bf16.msra.mxu0 %v1088_v25  ;;  %v106_v5 = vsel %vm100_vm0, %v95_v63, 0.0  ;;  %v1124_v25 = vld [vmem:[#allocation8 + $0x30] sm:$0xff]  }
  0x61   :  { %1002 = vmatpush3.bf16.msra.mxu1 %v1089_v26  ;;  %981 = vmatprep.subr.bf16.mxu0 %v1090_v27  ;;  %v105_v7 = vadd.f32 %v104_v3, %v103_v2  ;;  %v1126_v26 = vld [vmem:[#allocation8 + $0x78] sm:$0xff]   ;;  %v1125_v27 = vld [vmem:[#allocation8 + $0xb0] sm:$0xff]  }
  0x62   :  { %1003 = vmatprep.subr.bf16.mxu1 %v1091_v28  ;;  %v1127_v28 = vld [vmem:[#allocation8 + $0xf8] sm:$0xff]  }
  0x63   :  { %v107_v10 = vadd.f32 %v106_v5, %v105_v7 }
  0x64   :  { %982 = vmatpush3.bf16.msra.mxu0 %v1092_v33  ;;  %v1129_v33 = vld [vmem:[#allocation8 + $0xb8] sm:$0xff]  }
  0x65   :  { %1004 = vmatpush3.bf16.msra.mxu1 %v1093_v34  ;;  %983 = vmatprep.subr.bf16.mxu0 %v1094_v35  ;;  %v581_v34 = vcombine.high %v580_v32, %v580_v32  ;;  %v588_v35 = vrot.slane %v580_v32, %v1339_v37 }
  0x66   :  { %1005 = vmatprep.subr.bf16.mxu1 %v1095_v36  ;;  %108 = vadd.xlane.f32.xlu0 %v107_v10  ;;  %v111_v36 = vmul.f32 %v76_v31, %v76_v31 }
  0x67   :  { %v595_v38 = vrot.slane %v581_v34, %v1339_v37  ;;  %v596_v41 = vcombine.high %v588_v35, %v588_v35 }
  0x68   :  { %984 = vmatpush3.bf16.msra.mxu0 %v1096_v39  ;;  %v113_v39 = vcombine.high %v111_v36, %v111_v36 }
  0x69   :  { %1006 = vmatpush3.bf16.msra.mxu1 %v1097_v40  ;;  %1013 = vmatprep.subr.bf16.mxu0 %v1098_v44  ;;  %v120_v40 = vrot.slane %v111_v36, %v1342_v45  ;;  %v597_v42 = vcombine.high %v595_v38, %v595_v38 }
  0x6a   :  { %1035 = vmatprep.subr.bf16.mxu1 %v1099_v46  ;;  %v127_v43 = vrot.slane %v113_v39, %v1342_v45 }
  0x6b   :  { %462 = vmatmul.mubr.bf16.vlgmr.msra.gmra.mrb[0].mxu0 %v223_v49  ;;  %v128_v44 = vcombine.high %v120_v40, %v120_v40  ;;  %v134_v46 = vsel %vm100_vm0, %v120_v40, 0.0 }
  0x6c   :  { %1014 = vmatpush3.bf16.msra.mxu0 %v1100_v51  ;;  %502 = vmatmul.mubr.bf16.vlgmr.msra.gmra.mrb[0].mxu1 %v231_v54  ;;  %v129_v47 = vcombine.high %v127_v43, %v127_v43  ;;  %v137_v49 = vsel %vm100_vm0, %v127_v43, 0.0 }
  0x6d   :  { %1015 = vmatprep.subr.bf16.mxu0 %v1102_v55  ;;  %1036 = vmatpush3.bf16.msra.mxu1 %v1101_v57  ;;  %v135_v48 = vsel %vm100_vm0, %v128_v44, 0.0 }
  0x6e   :  { %1037 = vmatprep.subr.bf16.mxu1 %v1103_v61  ;;  %826 = vmatprep.mubr.bf16.mxu0 %v595_v38  ;;  %v136_v37 = vadd.f32 %v135_v48, %v134_v46  ;;  %v139_v50 = vsel %vm100_vm0, %v129_v47, 0.0 }
  0x6f   :  { %866 = vmatprep.mubr.bf16.mxu1 %v597_v42 }
  0x70   :  { %1016 = vmatpush3.bf16.msra.mxu0 %v1104_v62  ;;  %v138_v51 = vadd.f32 %v137_v49, %v136_v37 }
  0x71   :  { %1017 = vmatprep.subr.bf16.mxu0 %v1106_v1  ;;  %1038 = vmatpush3.bf16.msra.mxu1 %v1105_v4 }
  0x72   :  { %1039 = vmatprep.subr.bf16.mxu1 %v1107_v6  ;;  %v140_v52 = vadd.f32 %v139_v50, %v138_v51 }
  0x74   :  { %1018 = vmatpush3.bf16.msra.mxu0 %v1108_v8  ;;  %141 = vadd.xlane.f32.xlu0 %v140_v52 }
  0x75   :  { %1019 = vmatprep.subr.bf16.mxu0 %v1110_v9  ;;  %1040 = vmatpush3.bf16.msra.mxu1 %v1109_v11 }
  0x76   :  { %1041 = vmatprep.subr.bf16.mxu1 %v1111_v12 }
  0x78   :  { %1020 = vmatpush3.bf16.msra.mxu0 %v1112_v13 }
  0x79   :  { %1021 = vmatprep.subr.bf16.mxu0 %v1114_v14  ;;  %1042 = vmatpush3.bf16.msra.mxu1 %v1113_v15 }
  0x7a   :  { %1043 = vmatprep.subr.bf16.mxu1 %v1115_v16  ;;  %v968_v16 = vld [vmem:[%s1380_s4] ss:$0 sm:$0xff] }
  0x7c   :  { %1022 = vmatpush3.bf16.msra.mxu0 %v1116_v17 }
  0x7d   :  { %1023 = vmatprep.subr.bf16.mxu0 %v1118_v18  ;;  %1044 = vmatpush3.bf16.msra.mxu1 %v1117_v19 }
  0x7e   :  { %1045 = vmatprep.subr.bf16.mxu1 %v1119_v20 }
  0x80   :  { %1024 = vmatpush3.bf16.msra.mxu0 %v1120_v21 }
  0x81   :  { %1025 = vmatprep.subr.bf16.mxu0 %v1122_v22  ;;  %1046 = vmatpush3.bf16.msra.mxu1 %v1121_v23 }
  0x82   :  { %1047 = vmatprep.subr.bf16.mxu1 %v1123_v24 }
  0x84   :  { %1026 = vmatpush3.bf16.msra.mxu0 %v1124_v25 }
  0x85   :  { %1027 = vmatprep.subr.bf16.mxu0 %v1126_v26  ;;  %1048 = vmatpush3.bf16.msra.mxu1 %v1125_v27 }
  0x86   :  { %1049 = vmatprep.subr.bf16.mxu1 %v1127_v28 }
  0x88   :  { %1028 = vmatpush3.bf16.msra.mxu0 %v1128_v30 }
  0x89   :  { %1050 = vmatpush3.bf16.msra.mxu1 %v1129_v33 }
  0x8b   :  { %827 = vmatmul.mubr.bf16.vlgmr.msra.gmra.mrb[4].mxu0 %v588_v35 }
  0x8c   :  { %867 = vmatmul.mubr.bf16.vlgmr.msra.gmra.mrb[4].mxu1 %v596_v41 }
  0xf3   :  { %v109_v63 = vpop.xlane.xlu0 %108 }
  0xf4   :  { %1130 = vrsqrt.f32 %v109_v63 }
  0xfe   :  { %v1131_v8 = vpop.eup %1130 }
 0x101   :  { %v142_v0 = vpop.xlane.xlu0 %141 }
 0x102   :  { %1132 = vrsqrt.f32 %v142_v0 }
 0x10c   :  { %v1133_v11 = vpop.eup %1132 }
 0x13e   :  { %v985_v53 = vpop.f32.mrb[0].mxu0 }
 0x13f   :  { %v986_v54 = vpop.f32.mrb[1].mxu0  ;;  %v1007_v45 = vpop.f32.mrb[0].mxu1 }
 0x140   :  { %v987_v55 = vadd.f32 %v986_v54, %v985_v53  ;;  %v988_v56 = vpop.f32.mrb[2].mxu0  ;;  %v1008_v57 = vpop.f32.mrb[1].mxu1 }
 0x141   :  { %v989_v58 = vpop.f32.mrb[3].mxu0  ;;  %v1009_v59 = vadd.f32 %v1008_v57, %v1007_v45  ;;  %v1010_v60 = vpop.f32.mrb[2].mxu1 }
 0x142   :  { %v1011_v61 = vpop.f32.mrb[3].mxu1 }
 0x143   :  { %v504_v62 = vadd.f32 %v1009_v59, %v987_v55 }
 0x145   :  { %v874_v14 = vmul.f32 %v1131_v8, %v504_v62 }
 0x15e   :  { %v1029_v1 = vpop.f32.mrb[4].mxu0 }
 0x15f   :  { %v1030_v2 = vpop.f32.mrb[5].mxu0  ;;  %v1051_v3 = vpop.f32.mrb[4].mxu1 }
 0x160   :  { %v1031_v4 = vadd.f32 %v1030_v2, %v1029_v1  ;;  %v1032_v5 = vpop.f32.mrb[6].mxu0  ;;  %v1052_v6 = vpop.f32.mrb[5].mxu1 }
 0x161   :  { %v1033_v7 = vpop.f32.mrb[7].mxu0  ;;  %v1053_v9 = vadd.f32 %v1052_v6, %v1051_v3  ;;  %v1054_v10 = vpop.f32.mrb[6].mxu1 }
 0x162   :  { %v1055_v12 = vpop.f32.mrb[7].mxu1 }
 0x163   :  { %v869_v13 = vadd.f32 %v1053_v9, %v1031_v4 }
 0x165   :  { %v875_v15 = vmul.f32 %v1133_v11, %v869_v13 }
 0x167   :  { %v876_v17 = vadd.f32 %v875_v15, %v874_v14 }
 0x169   :  { %v884_v18 = vadd.f32 %v968_v16, %v876_v17 }
 0x16b   :  { %v885_v19 = vmax.f32 %v884_v18, 0.0 }
 0x16d   :  { %886 = vst [vmem:[#allocation10] sm:$0x3] %v885_v19 }
 0x16e   :  { %1233 = shalt.err (!%p1230_p8)
}
 0x16f   :  { %s1234_s20 = scalar_lea.hbm %s1381_s5, 32 }
 0x170   :  { %p1235_p9 = scmp.ne.s32.totalorder %s1381_s5, %s1234_s20  ;;  %p1238_p10 = scmp.lt.u32.totalorder %s1234_s20, %s1381_s5 }
 0x172   :  { %p1240_p11 = pnand %p1238_p10, %p1235_p9 }
 0x174   :  { %1243 = shalt.err (!%p1240_p11)
}
 0x175   :  { %896 = dma.vmem_to_hbm [thread:$0]  %s894_s16, 32, %s1381_s5, [#allocation4]  }
 0x176   :  { %1250 = dma.done.wait [#allocation4], 32  }
 0x177   :  { %1251 = vsyncadd [#allocation4], 4294967264 }
 0x178   :  { %900 = vsyncpa [#allocation3], 1 }
 0x179   :  { %901 = vsyncpa [#allocation6], 1 }
 0x17a   :  { %902 = vsyncpa [#allocation9], 1 }
 0x17b   :  { %903 = vsyncpa [#allocation4], 1 }

</bundles_post_ra>
